<compile_context>
chip_gen: v7x
topology: tpu7x:2x2x1
jax: 0.10.0
libtpu: 0.0.40
codegen_flags: <defaults>
</compile_context>

<pallas_src>
import jax
import jax.numpy as jnp
from jax import lax
from jax.experimental import pallas as pl
from jax.experimental.pallas import tpu as pltpu


# ---------------------------------------------------------------------------
# Kernels
# ---------------------------------------------------------------------------

def _dot_nt(x, w):
    # (tm, tk) x (tn, tk) -> (tm, tn); contracts the K dim of both operands so
    # the PyTorch (out, in) weight layout is consumed as-is (MXU "NT" matmul).
    return lax.dot_general(
        x, w,
        dimension_numbers=(((1,), (1,)), ((), ())),
        preferred_element_type=jnp.float32,
    )


def _linear_kernel_single_k(x_ref, w_ref, o_ref):
    """Whole K resident: one matmul, no accumulator, no reduction axis."""
    o_ref[...] = _dot_nt(x_ref[...], w_ref[...]).astype(o_ref.dtype)


def _linear_kernel_acc_out(x_ref, w_ref, o_ref):
    """K grid axis with f32 output: accumulate directly into the output tile."""
    @pl.when(pl.program_id(2) == 0)
    def _():
        o_ref[...] = jnp.zeros_like(o_ref)

    o_ref[...] += _dot_nt(x_ref[...], w_ref[...])


def _linear_kernel_acc_scratch(x_ref, w_ref, o_ref, acc_ref):
    """K grid axis with non-f32 output: accumulate in an f32 VMEM scratch."""
    @pl.when(pl.program_id(2) == 0)
    def _():
        acc_ref[...] = jnp.zeros_like(acc_ref)

    acc_ref[...] += _dot_nt(x_ref[...], w_ref[...])

    @pl.when(pl.program_id(2) == pl.num_programs(2) - 1)
    def _():
        o_ref[...] = acc_ref[...].astype(o_ref.dtype)


# ---------------------------------------------------------------------------
# Generation-aware sizing
# ---------------------------------------------------------------------------

def _vmem_policy():
    """Returns (tile_budget_bytes, vmem_limit_bytes, two_core, weight_buffers)."""
    cap = None
    try:
        cap = int(pltpu.get_tpu_info().vmem_capacity_bytes)
    except Exception:
        cap = None
    if cap is None:
        try:
            kind = jax.devices()[0].device_kind.lower()
        except Exception:
            kind = ""
        cap = 64 * 1024 * 1024 if "v7" in kind else 128 * 1024 * 1024

    if cap <= 64 * 1024 * 1024:
        # v7x-class: 64 MiB per TensorCore, 2 TCs/chip -> fit tightly, feed both
        # cores; 3.2 TB/s HBM tolerates somewhat smaller tiles.
        return 40 * 1024 * 1024, 48 * 1024 * 1024, True, 2
    # v5e/v6e-class: 128 MiB physical VMEM -> big tiles, triple-buffered weights.
    return 64 * 1024 * 1024, 96 * 1024 * 1024, False, 3


def _divisor_candidates(dim, ladder):
    # Full extent is always a legal block shape; ladder entries must divide dim
    # (keeps the grid exact and tiles (8, 128)-aligned).
    cands = [dim]
    for t in ladder:
        if t < dim and dim % t == 0:
            cands.append(t)
    return cands


def _pick_tiles(M, N, K, x_sz, w_sz, o_sz, out_dtype,
                budget_bytes, weight_buffers, min_tm):
    tm_ladder = tuple(t for t in (1024, 512, 256, 128, 64, 32, 16, 8) if t >= min_tm)
    tm_cands = _divisor_candidates(M, tm_ladder)
    tn_cands = _divisor_candidates(N, (2048, 1024, 512, 256, 128))
    tk_cands = _divisor_candidates(K, (4096, 2048, 1024, 512, 256, 128))
    needs_scratch = jnp.dtype(out_dtype) != jnp.dtype(jnp.float32)

    def footprint(tm_, tn_, tk_):
        kt = K // tk_
        w_bufs = weight_buffers if kt > 1 else 2
        fp = 2 * tm_ * tk_ * x_sz + w_bufs * tn_ * tk_ * w_sz
        if kt > 1:
            fp += tm_ * tn_ * o_sz            # output tile resident across k
            if needs_scratch:
                fp += tm_ * tn_ * 4           # f32 scratch accumulator
        else:
            fp += 2 * tm_ * tn_ * o_sz        # output tile double-buffered
        return fp

    # Greedy first-fit: prefer tm == M (weight is DMA'd from HBM exactly once),
    # then the widest lane-dense N tile, then the largest K chunk.
    for tm in tm_cands:
        for tn in tn_cands:
            for tk in tk_cands:
                if footprint(tm, tn, tk) <= budget_bytes:
                    return tm, tn, tk
    # Fallback: smallest legal tiles even if over budget (vmem_limit gates it).
    return tm_cands[-1], tn_cands[-1], tk_cands[-1]


def _make_weight_spec(tn, tk, index_map, buffers):
    # Triple-buffer the weight stream where VMEM allows (v5e/v6e); guarded so an
    # older Pallas without pipeline_mode/Buffered still works.
    if buffers > 2 and hasattr(pl, "Buffered"):
        try:
            return pl.BlockSpec((tn, tk), index_map,
                                pipeline_mode=pl.Buffered(buffers))
        except TypeError:
            pass
    return pl.BlockSpec((tn, tk), index_map)


# ---------------------------------------------------------------------------
# Forward pass
# ---------------------------------------------------------------------------

def generator_forward(x, weight, _force_budget_bytes=None):
    """Computes x @ weight.T (PyTorch nn.Linear, bias=False).

    x:      (batch, input_size)
    weight: (output_size, input_size)   -- PyTorch layout, used as-is
    returns (batch, output_size), dtype == x.dtype
    """
    M, K = x.shape
    N, K2 = weight.shape
    assert K == K2, "input_size mismatch"

    out_dtype = x.dtype
    x_sz = jnp.dtype(x.dtype).itemsize
    w_sz = jnp.dtype(weight.dtype).itemsize
    o_sz = jnp.dtype(out_dtype).itemsize

    budget, vmem_limit, two_core, w_bufs = _vmem_policy()
    if _force_budget_bytes is not None:       # testing hook only
        budget = _force_budget_bytes
    min_tm = {4: 8, 2: 16, 1: 32}.get(x_sz, 8)

    tm, tn, tk = _pick_tiles(M, N, K, x_sz, w_sz, o_sz, out_dtype,
                             budget, w_bufs, min_tm)

    # v7x: make sure at least one "parallel" grid axis has >= 2 steps so both
    # TensorCores get work (only if the halved tile stays legally aligned).
    if two_core and (M // tm) == 1 and (N // tn) == 1:
        if tn % 256 == 0:
            tn //= 2
        elif tm % 16 == 0 and tm // 2 >= min_tm:
            tm //= 2

    kt = K // tk
    out_shape = jax.ShapeDtypeStruct((M, N), out_dtype)
    cost = pl.CostEstimate(
        flops=2 * M * N * K,
        transcendentals=0,
        bytes_accessed=int(M * K * x_sz + N * K * w_sz + M * N * o_sz),
    )

    if kt == 1:
        # Whole K resident: no reduction axis, no accumulator at all.
        return pl.pallas_call(
            _linear_kernel_single_k,
            out_shape=out_shape,
            grid_spec=pltpu.PrefetchScalarGridSpec(
                num_scalar_prefetch=0,
                grid=(M // tm, N // tn),
                in_specs=[
                    pl.BlockSpec((tm, tk), lambda i, j: (i, 0)),
                    pl.BlockSpec((tn, tk), lambda i, j: (j, 0)),
                ],
                out_specs=pl.BlockSpec((tm, tn), lambda i, j: (i, j)),
            ),
            compiler_params=pltpu.CompilerParams(
                dimension_semantics=("parallel", "parallel"),
                vmem_limit_bytes=vmem_limit,
            ),
            cost_estimate=cost,
        )(x, weight)

    # Large K: keep a reduction axis (last in the grid).
    grid = (M // tm, N // tn, kt)
    in_specs = [
        pl.BlockSpec((tm, tk), lambda i, j, k: (i, k)),
        _make_weight_spec(tn, tk, lambda i, j, k: (j, k), w_bufs),
    ]
    out_spec = pl.BlockSpec((tm, tn), lambda i, j, k: (i, j))
    params = pltpu.CompilerParams(
        dimension_semantics=("parallel", "parallel", "arbitrary"),
        vmem_limit_bytes=vmem_limit,
    )

    if jnp.dtype(out_dtype) == jnp.dtype(jnp.float32):
        # Accumulate straight into the (resident) f32 output tile.
        return pl.pallas_call(
            _linear_kernel_acc_out,
            out_shape=out_shape,
            grid_spec=pltpu.PrefetchScalarGridSpec(
                num_scalar_prefetch=0, grid=grid,
                in_specs=in_specs, out_specs=out_spec,
            ),
            compiler_params=params,
            cost_estimate=cost,
        )(x, weight)

    return pl.pallas_call(
        _linear_kernel_acc_scratch,
        out_shape=out_shape,
        grid_spec=pltpu.PrefetchScalarGridSpec(
            num_scalar_prefetch=0, grid=grid,
            in_specs=in_specs, out_specs=out_spec,
            scratch_shapes=[pltpu.VMEM((tm, tn), jnp.float32)],
        ),
        compiler_params=params,
        cost_estimate=cost,
    )(x, weight)


# ---------------------------------------------------------------------------
# Self-test
# ---------------------------------------------------------------------------

if __name__ == "__main__":
    key = jax.random.PRNGKey(0)

    # 1) Primary shape consistent with Generator(input_size, output_size):
    #    whole problem fits in one tile -> single DMA-in / matmul / DMA-out.
    batch, input_size, output_size = 8, 256, 128
    kx, kw, key = jax.random.split(key, 3)
    x = jax.random.normal(kx, (batch, input_size), dtype=jnp.float32)
    bound = 1.0 / jnp.sqrt(input_size)
    weight = jax.random.uniform(
        kw, (output_size, input_size), dtype=jnp.float32,
        minval=-bound, maxval=bound,
    )
    y = jax.block_until_ready(generator_forward(x, weight))
    y_ref = x @ weight.T
    assert y.shape == (batch, output_size)
    assert jnp.allclose(y, y_ref, atol=1e-5, rtol=1e-5), "mismatch (single-K)"

    # 2) Larger K, still fits the generation budget as a single K tile
    #    (tm == M, weight streamed from HBM exactly once).
    batch2, input_size2, output_size2 = 16, 4096, 128
    kx2, kw2, key = jax.random.split(key, 3)
    x2 = jax.random.normal(kx2, (batch2, input_size2), dtype=jnp.float32)
    bound2 = 1.0 / jnp.sqrt(input_size2)
    weight2 = jax.random.uniform(
        kw2, (output_size2, input_size2), dtype=jnp.float32,
        minval=-bound2, maxval=bound2,
    )
    y2 = jax.block_until_ready(generator_forward(x2, weight2))
    y2_ref = x2 @ weight2.T
    assert y2.shape == (batch2, output_size2)
    assert jnp.allclose(y2, y2_ref, atol=1e-4, rtol=1e-4), "mismatch (big single-K)"

    # 3) Force the K-reduction path (f32: accumulate into o_ref) with a tiny
    #    artificial VMEM budget so the tile picker must split K.
    y3 = jax.block_until_ready(
        generator_forward(x2, weight2, _force_budget_bytes=2 * 1024 * 1024))
    assert jnp.allclose(y3, y2_ref, atol=1e-4, rtol=1e-4), "mismatch (K-loop f32)"

    # 4) Force the K-reduction + f32-scratch path (bf16 in/out).
    x4 = x2.astype(jnp.bfloat16)
    w4 = weight2.astype(jnp.bfloat16)
    y4 = jax.block_until_ready(
        generator_forward(x4, w4, _force_budget_bytes=1 * 1024 * 1024))
    y4_ref = x4.astype(jnp.float32) @ w4.astype(jnp.float32).T
    assert y4.dtype == jnp.bfloat16
    assert jnp.allclose(y4.astype(jnp.float32), y4_ref, atol=5e-2, rtol=5e-2), \
        "mismatch (K-loop bf16 scratch)"

    print("KERNEL_OK")
</pallas_src>

<mosaic_0001>
module attributes {stable_mosaic.version = 11 : i64} {
  func.func @_linear_kernel_single_k(%arg0: i32, %arg1: i32, %arg2: memref<8x256xf32, #tpu.memory_space<vmem>>, %arg3: memref<128x256xf32, #tpu.memory_space<vmem>>, %arg4: memref<8x128xf32, #tpu.memory_space<vmem>>) attributes {dimension_semantics = [#tpu.dimension_semantics<parallel>, #tpu.dimension_semantics<parallel>], iteration_bounds = array<i64: 1, 1>, scalar_prefetch = 0 : i64, scratch_operands = 0 : i64, tpu.core_type = #tpu.core_type<tc>, window_params = [{transform_indices = @transform_0, window_bounds = array<i64: 8, 256>}, {transform_indices = @transform_1, window_bounds = array<i64: 128, 256>}, {transform_indices = @transform_2, window_bounds = array<i64: 8, 128>}]} {
    %c0 = arith.constant 0 : index
    %c0_0 = arith.constant 0 : index
    %0 = vector.load %arg2[%c0, %c0_0] : memref<8x256xf32, #tpu.memory_space<vmem>>, vector<8x256xf32>
    %c0_1 = arith.constant 0 : index
    %c0_2 = arith.constant 0 : index
    %1 = vector.load %arg3[%c0_1, %c0_2] : memref<128x256xf32, #tpu.memory_space<vmem>>, vector<128x256xf32>
    %cst = arith.constant dense<0.000000e+00> : vector<8x128xf32>
    %2 = tpu.matmul %0, %1, %cst {dimension_numbers = #tpu.dot_dimension_numbers<[1], [1], [0], [0], [0, 0, 1, 0], [], []>} : vector<8x256xf32>, vector<128x256xf32>, vector<8x128xf32> -> vector<8x128xf32>
    %c0_3 = arith.constant 0 : index
    %c0_4 = arith.constant 0 : index
    %3 = vector.load %arg4[%c0_3, %c0_4] : memref<8x128xf32, #tpu.memory_space<vmem>>, vector<8x128xf32>
    tpu.vector_store %arg4[%c0_3, %c0_4], %2 {strides = array<i32>} : memref<8x128xf32, #tpu.memory_space<vmem>>, vector<8x128xf32>,
    return
  }
  func.func @transform_0(%arg0: i32, %arg1: i32) -> (i32, i32) {
    %c0_i32 = arith.constant 0 : i32
    %c0_i32_0 = arith.constant 0 : i32
    return %arg0, %c0_i32 : i32, i32
  }
  func.func @transform_1(%arg0: i32, %arg1: i32) -> (i32, i32) {
    %c0_i32 = arith.constant 0 : i32
    %c0_i32_0 = arith.constant 0 : i32
    return %arg1, %c0_i32 : i32, i32
  }
  func.func @transform_2(%arg0: i32, %arg1: i32) -> (i32, i32) {
    %c0_i32 = arith.constant 0 : i32
    return %arg0, %arg1 : i32, i32
  }
}

</mosaic_0001>

<bundles_post_ra>
// kernel: tpu_custom_call.1
= control target key start
LH: loop header
LB: loop body
LE: loop exit
PB: predicated region body
PF: predicated region fallthrough
CT: control target
= control target key end

     0   :  { %7 = vsyncpa [#allocation3], 0  ;;  %s331_s0 = inlined_call_operand.hbm [shape: f32[8,256], index: 0, kind: input, shape index: {}]   ;;  %s332_s1 = inlined_call_operand.hbm [shape: f32[128,256], index: 1, kind: input, shape index: {}]   ;;  %s333_s2 = inlined_call_operand.hbm [shape: f32[8,128], index: 2, kind: output, shape index: {}]  }
   0x1   :  { %8 = vsyncpa [#allocation6], 0 }
   0x2   :  { %9 = vsyncpa [#allocation4], 0  ;;  %s268_s9 = smov [#allocation2]   ;;  %s269_s11 = smov [#allocation5]  }
   0x3   :  { %s16_s10 = sshll.u32 %s268_s9, 4  ;;  %s25_s12 = sshll.u32 %s269_s11, 4  ;;  %s17_s10 = int_to_ptr.vmem [resolvable:$true] %s16_s10  ;;  %s288_s12 = int_to_ptr.vmem [resolvable:$true] %s25_s12 }
   0x4   :  { %s196_s15 = scalar_lea.hbm %s331_s0, 256 }
   0x5   :  { %p197_p0 = scmp.ne.s32.totalorder %s331_s0, %s196_s15  ;;  %p200_p1 = scmp.lt.u32.totalorder %s196_s15, %s331_s0 }
   0x7   :  { %p202_p2 = pnand %p200_p1, %p197_p0 }
   0x9   :  { %205 = shalt.err (!%p202_p2)
}
   0xa   :  { %s206_s20 = scalar_lea.vmem %s17_s10, 256  ;;  %p211_p4 = scmp.lt.s32.totalorder %s17_s10, %s17_s10 }
   0xb   :  { %p207_p3 = scmp.ne.s32.totalorder %s17_s10, %s206_s20  ;;  %p212_p5 = scmp.lt.s32.totalorder %s206_s20, %s206_s20 }
   0xd   :  { %p213_p6 = por %p212_p5, %p211_p4 }
   0xf   :  { %p214_p7 = pnand %p213_p6, %p207_p3 }
  0x11   :  { %217 = shalt.err (!%p214_p7)
}
  0x12   :  { %19 = dma.hbm_to_vmem [thread:$0]  %s331_s0, 256, %s17_s10, [#allocation3]  }
  0x13   :  { %s218_s25 = scalar_lea.hbm %s332_s1, 4096 }
  0x14   :  { %p219_p8 = scmp.ne.s32.totalorder %s332_s1, %s218_s25  ;;  %p222_p9 = scmp.lt.u32.totalorder %s218_s25, %s332_s1 }
  0x16   :  { %p224_p10 = pnand %p222_p9, %p219_p8 }
  0x18   :  { %227 = shalt.err (!%p224_p10)
}
  0x19   :  { %s228_s30 = scalar_lea.vmem %s288_s12, 4096  ;;  %p233_p12 = scmp.lt.s32.totalorder %s288_s12, %s288_s12 }
  0x1a   :  { %p229_p11 = scmp.ne.s32.totalorder %s288_s12, %s228_s30  ;;  %p234_p13 = scmp.lt.s32.totalorder %s228_s30, %s228_s30 }
  0x1c   :  { %p235_p0 = por %p234_p13, %p233_p12 }
  0x1e   :  { %p236_p1 = pnand %p235_p0, %p229_p11 }
  0x20   :  { %239 = shalt.err (!%p236_p1)
}
  0x21   :  { %s270_s0 = smov 256   ;;  %s271_s3 = smov 16  }
  0x22   :  { %31 = dma.hbm_to_vmem [thread:$0]  %s332_s1, 4096, %s288_s12, [#allocation6], %s270_s0, %s270_s0, %s271_s3  }
  0x23   :  { %262 = dma.done.wait [#allocation3], 256  }
  0x24   :  { %263 = vsyncadd [#allocation3], 4294967040 }
  0x25   :  { %264 = dma.done.wait [#allocation6], 4096  }
  0x26   :  { %265 = vsyncadd [#allocation6], 4294963200  ;;  %v41_v0 = vld [vmem:[#allocation5 + $0x8] sm:$0xff]  ;;  %v43_v1 = vld [vmem:[#allocation5 + $0x18] sm:$0xff]  ;;  %s272_s1 = smov [#allocation7]  }
  0x27   :  { %v40_v2 = vld [vmem:[#allocation5] sm:$0xff]  ;;  %v159_v3 = vpack.c.bf16 %v43_v1, %v41_v0  ;;  %v42_v4 = vld [vmem:[#allocation5 + $0x10] sm:$0xff]  ;;  %v45_v5 = vld [vmem:[#allocation5 + $0x28] sm:$0xff]  ;;  %s149_s6 = sshll.u32 %s272_s1, 4  ;;  %s150_s6 = int_to_ptr.vmem [resolvable:$true] %s149_s6 }
  0x28   :  { %v47_v6 = vld [vmem:[#allocation5 + $0x38] sm:$0xff]  ;;  %v161_v7 = vpack.c.bf16 %v42_v4, %v40_v2  ;;  %v44_v9 = vld [vmem:[#allocation5 + $0x20] sm:$0xff]  ;;  %v46_v10 = vld [vmem:[#allocation5 + $0x30] sm:$0xff]  ;;  %s240_s7 = scalar_lea.vmem %s150_s6, 128  ;;  %p245_p3 = scmp.lt.s32.totalorder %s150_s6, %s150_s6 }
  0x29   :  { %v163_v8 = vpack.c.bf16 %v47_v6, %v45_v5  ;;  %160 = vmatprep.subr.bf16.mxu0 %v159_v3  ;;  %v49_v11 = vld [vmem:[#allocation5 + $0x48] sm:$0xff]  ;;  %v51_v12 = vld [vmem:[#allocation5 + $0x58] sm:$0xff]  ;;  %v165_v13 = vpack.c.bf16 %v46_v10, %v44_v9  ;;  %v48_v16 = vld [vmem:[#allocation5 + $0x40] sm:$0xff]  ;;  %p241_p2 = scmp.ne.s32.totalorder %s150_s6, %s240_s7  ;;  %p246_p4 = scmp.lt.s32.totalorder %s240_s7, %s240_s7 }
  0x2a   :  { %162 = vmatpush1.bf16.xpose.msra.mxu0 %v161_v7  ;;  %v167_v14 = vpack.c.bf16 %v51_v12, %v49_v11  ;;  %v39_v15 = vld [vmem:[#allocation2 + $0x8] sm:$0xff]  ;;  %v50_v17 = vld [vmem:[#allocation5 + $0x50] sm:$0xff]  ;;  %v53_v18 = vld [vmem:[#allocation5 + $0x68] sm:$0xff] }
  0x2b   :  { %164 = vmatprep.subr.bf16.mxu0 %v163_v8  ;;  %136 = vmatprep.mubr.f32.mxu0 %v39_v15  ;;  %v55_v19 = vld [vmem:[#allocation5 + $0x78] sm:$0xff]  ;;  %v169_v20 = vpack.c.bf16 %v50_v17, %v48_v16  ;;  %v52_v22 = vld [vmem:[#allocation5 + $0x60] sm:$0xff]  ;;  %v54_v23 = vld [vmem:[#allocation5 + $0x70] sm:$0xff]  ;;  %p247_p5 = por %p246_p4, %p245_p3 }
  0x2c   :  { %v171_v21 = vpack.c.bf16 %v55_v19, %v53_v18  ;;  %v57_v24 = vld [vmem:[#allocation5 + $0x88] sm:$0xff]  ;;  %v59_v25 = vld [vmem:[#allocation5 + $0x98] sm:$0xff]  ;;  %v173_v26 = vpack.c.bf16 %v54_v23, %v52_v22  ;;  %v56_v28 = vld [vmem:[#allocation5 + $0x80] sm:$0xff] }
  0x2d   :  { %v175_v27 = vpack.c.bf16 %v59_v25, %v57_v24  ;;  %v58_v29 = vld [vmem:[#allocation5 + $0x90] sm:$0xff]  ;;  %v61_v30 = vld [vmem:[#allocation5 + $0xa8] sm:$0xff]  ;;  %v63_v31 = vld [vmem:[#allocation5 + $0xb8] sm:$0xff]  ;;  %p248_p6 = pnand %p247_p5, %p241_p2 }
  0x2e   :  { %v177_v32 = vpack.c.bf16 %v58_v29, %v56_v28  ;;  %v179_v33 = vpack.c.bf16 %v63_v31, %v61_v30  ;;  %v60_v34 = vld [vmem:[#allocation5 + $0xa0] sm:$0xff]  ;;  %v62_v35 = vld [vmem:[#allocation5 + $0xb0] sm:$0xff]  ;;  %v65_v36 = vld [vmem:[#allocation5 + $0xc8] sm:$0xff] }
  0x2f   :  { %v67_v37 = vld [vmem:[#allocation5 + $0xd8] sm:$0xff]  ;;  %v181_v38 = vpack.c.bf16 %v62_v35, %v60_v34  ;;  %v64_v40 = vld [vmem:[#allocation5 + $0xc0] sm:$0xff]  ;;  %v66_v41 = vld [vmem:[#allocation5 + $0xd0] sm:$0xff] }
  0x30   :  { %v183_v39 = vpack.c.bf16 %v67_v37, %v65_v36  ;;  %v69_v42 = vld [vmem:[#allocation5 + $0xe8] sm:$0xff]  ;;  %v71_v43 = vld [vmem:[#allocation5 + $0xf8] sm:$0xff]  ;;  %v185_v44 = vpack.c.bf16 %v66_v41, %v64_v40  ;;  %v68_v46 = vld [vmem:[#allocation5 + $0xe0] sm:$0xff] }
  0x31   :  { %v187_v45 = vpack.c.bf16 %v71_v43, %v69_v42  ;;  %v70_v47 = vld [vmem:[#allocation5 + $0xf0] sm:$0xff] }
  0x32   :  { %166 = vmatpush1.bf16.xpose.msra.mxu0 %v165_v13  ;;  %v189_v48 = vpack.c.bf16 %v70_v47, %v68_v46  ;;  %v38_v49 = vld [vmem:[#allocation2] sm:$0xff] }
  0x33   :  { %168 = vmatprep.subr.bf16.mxu0 %v167_v14 }
  0x3a   :  { %170 = vmatpush1.bf16.xpose.msra.mxu0 %v169_v20 }
  0x3b   :  { %172 = vmatprep.subr.bf16.mxu0 %v171_v21 }
  0x42   :  { %174 = vmatpush1.bf16.xpose.msra.mxu0 %v173_v26 }
  0x43   :  { %176 = vmatprep.subr.bf16.mxu0 %v175_v27 }
  0x4a   :  { %178 = vmatpush1.bf16.xpose.msra.mxu0 %v177_v32 }
  0x4b   :  { %180 = vmatprep.subr.bf16.mxu0 %v179_v33 }
  0x52   :  { %182 = vmatpush1.bf16.xpose.msra.mxu0 %v181_v38 }
  0x53   :  { %184 = vmatprep.subr.bf16.mxu0 %v183_v39 }
  0x5a   :  { %186 = vmatpush1.bf16.xpose.msra.mxu0 %v185_v44 }
  0x5b   :  { %188 = vmatprep.subr.bf16.mxu0 %v187_v45 }
  0x62   :  { %190 = vmatpush1.bf16.xpose.msra.mxu0 %v189_v48 }
  0x69   :  { %137 = vmatmul.mubr.f32.vlgmr.msra.gmra.mrb[0].mxu0 %v38_v49 }
 0x13c   :  { %v138_v50 = vpop.f32.mrb[0].mxu0 }
 0x13d   :  { %142 = vst [vmem:[#allocation7] sm:$0xff] %v138_v50  ;;  %v140_v51 = vpop.f32.mrb[1].mxu0 }
 0x13e   :  { %251 = shalt.err (!%p248_p6)
}
 0x13f   :  { %s252_s10 = scalar_lea.hbm %s333_s2, 128 }
 0x140   :  { %p253_p7 = scmp.ne.s32.totalorder %s333_s2, %s252_s10  ;;  %p256_p8 = scmp.lt.u32.totalorder %s252_s10, %s333_s2 }
 0x142   :  { %p258_p9 = pnand %p256_p8, %p253_p7 }
 0x144   :  { %261 = shalt.err (!%p258_p9)
}
 0x145   :  { %152 = dma.vmem_to_hbm [thread:$0]  %s150_s6, 128, %s333_s2, [#allocation4]  }
 0x146   :  { %266 = dma.done.wait [#allocation4], 128  }
 0x147   :  { %267 = vsyncadd [#allocation4], 4294967168 }
 0x148   :  { %156 = vsyncpa [#allocation3], 1 }
 0x149   :  { %157 = vsyncpa [#allocation6], 1 }
 0x14a   :  { %158 = vsyncpa [#allocation4], 1 }

</bundles_post_ra>
